<compile_context>
chip_gen: v7x
topology: tpu7x:2x2x1
jax: 0.10.0
libtpu: 0.0.40
codegen_flags: <defaults>
</compile_context>

<pallas_src>
import functools
import math

import jax
import jax.numpy as jnp
from jax import lax
from jax.experimental import pallas as pl
from jax.experimental.pallas import tpu as pltpu

EPS = 1e-5  # PyTorch nn.LayerNorm default


def _layernorm_kernel(x_ref, wb_ref, o_ref):
    # x_ref: (bt, F) batch tile; wb_ref: (2, F) f32 [weight; bias]; o_ref: (bt, F)
    x = x_ref[...].astype(jnp.float32)
    inv_f = 1.0 / x.shape[-1]
    # Pass 1: mean.  Pass 2: centered variance (numerically robust, matches
    # torch's centered computation; tile already resident so it's slack time).
    mean = jnp.sum(x, axis=-1, keepdims=True) * inv_f
    xc = x - mean
    var = jnp.sum(xc * xc, axis=-1, keepdims=True) * inv_f   # biased (torch)
    inv = lax.rsqrt(var + EPS)                               # (bt, 1), EUP
    w = wb_ref[0:1, :]
    b = wb_ref[1:2, :]
    # Row-broadcast inv first, lane-broadcast w/b last: no (bt,F) param temp.
    o_ref[...] = ((xc * inv) * w + b).astype(o_ref.dtype)


def _pick_batch_tile(b, feat, itemsize):
    """Pick the batch tile size.

    ~2 MiB per input tile: double-buffered in+out plus the in-kernel f32
    temporaries stays ~16-20 MiB, comfortably inside v7x's 64 MiB physical
    VMEM while amortizing the ~0.35 us per-grid-step overhead to <10-15%
    even at v7x HBM bandwidth.  Capped to at most ~B/2 (when B >= 16) so the
    grid has >= 2 steps and the parallel batch axis can span both v7x
    TensorCores.
    """
    target_bytes = 2 << 20  # ~2 MiB per input tile
    bt = max(8, target_bytes // max(1, feat * itemsize))
    bt = min(bt, 8192)
    bt = (bt // 8) * 8  # sublane alignment
    if b >= 16:
        half = ((b // 2) // 8) * 8
        bt = min(bt, max(8, half))
    if b <= bt:
        return b  # single full-extent block; no masking / padding needed
    return bt


@functools.partial(jax.jit, static_argnames=("n", "c"))
def normalization_layer(x, weight, bias, *, n, c):
    """Pallas implementation of NormalizationLayer.forward.

    x:      any shape whose numel is divisible by n*c
    weight: (n, c) LayerNorm scale
    bias:   (n, c) LayerNorm shift
    """
    # TODO(synk): for sub-~256KiB problems embedded in a larger XLA graph, a
    # plain-jnp path that XLA can fuse would beat the fixed pallas_call cost;
    # kept on the Pallas path here so the kernel itself is exercised.
    input_shape = x.shape
    feat = n * c
    total = math.prod(input_shape) if input_shape else 1
    b = total // feat

    # Flatten normalized dims -> lane-dense last axis (feat), reduce axis=-1.
    x2 = jnp.reshape(x, (b, feat))
    # Fuse weight/bias into one resident f32 (2, F) block (single input stream).
    wb = jnp.concatenate(
        [jnp.reshape(weight, (1, feat)), jnp.reshape(bias, (1, feat))], axis=0
    ).astype(jnp.float32)

    itemsize = jnp.dtype(x.dtype).itemsize
    bt = _pick_batch_tile(b, feat, itemsize)
    grid = pl.cdiv(b, bt)

    out2 = pl.pallas_call(
        _layernorm_kernel,
        out_shape=jax.ShapeDtypeStruct((b, feat), x.dtype),
        grid_spec=pltpu.PrefetchScalarGridSpec(
            num_scalar_prefetch=0,
            grid=(grid,),
            in_specs=[
                pl.BlockSpec((bt, feat), lambda i: (i, 0)),
                pl.BlockSpec((2, feat), lambda i: (0, 0)),
            ],
            out_specs=pl.BlockSpec((bt, feat), lambda i: (i, 0)),
        ),
        compiler_params=pltpu.CompilerParams(
            # Batch axis is embarrassingly parallel -> shards across both
            # TensorCores on v7x; no-op on v5e/v6e.
            dimension_semantics=("parallel",),
            # Actual footprint ~16-20 MiB with 2 MiB tiles; 48 MiB keeps
            # headroom and stays under v7x's 64 MiB physical VMEM.
            vmem_limit_bytes=48 * 1024 * 1024,
        ),
    )(x2, wb)

    return jnp.reshape(out2, input_shape)


def _reference(x, weight, bias, *, n, c):
    input_shape = x.shape
    b = x.size // (n * c)
    x3 = jnp.reshape(x, (b, n, c)).astype(jnp.float32)
    mean = jnp.mean(x3, axis=(1, 2), keepdims=True)
    var = jnp.mean((x3 - mean) ** 2, axis=(1, 2), keepdims=True)
    y = (x3 - mean) / jnp.sqrt(var + EPS) * weight[None] + bias[None]
    return jnp.reshape(y, input_shape).astype(x.dtype)


if __name__ == "__main__":
    key = jax.random.PRNGKey(0)
    kx, kx2, kw, kb = jax.random.split(key, 4)

    # Module config: NormalizationLayer(n=16, c=16)
    N, C = 16, 16
    weight = 1.0 + 0.1 * jax.random.normal(kw, (N, C), dtype=jnp.float32)
    bias = 0.1 * jax.random.normal(kb, (N, C), dtype=jnp.float32)

    # Case 1: STGCN-style feature map (batch=2, channels=4, n=16, c=16);
    # forward reshapes to (8, 16, 16), layernorms, reshapes back.  Non-zero
    # mean exercises the centered-variance path.
    x1 = jax.random.normal(kx, (2, 4, N, C), dtype=jnp.float32) + 3.0
    out1 = jax.block_until_ready(normalization_layer(x1, weight, bias, n=N, c=C))
    ref1 = _reference(x1, weight, bias, n=N, c=C)
    assert out1.shape == x1.shape
    assert jnp.allclose(out1, ref1, atol=1e-4, rtol=1e-4), (
        float(jnp.max(jnp.abs(out1 - ref1)))
    )

    # Case 2: ragged batch (B=20, tile=8 -> 3 grid steps, clipped partial
    # last block) to verify the unpadded cdiv-grid path.
    x2 = 0.5 * jax.random.normal(kx2, (5, 4, N, C), dtype=jnp.float32) + 1.0
    out2 = jax.block_until_ready(normalization_layer(x2, weight, bias, n=N, c=C))
    ref2 = _reference(x2, weight, bias, n=N, c=C)
    assert out2.shape == x2.shape
    assert jnp.allclose(out2, ref2, atol=1e-4, rtol=1e-4), (
        float(jnp.max(jnp.abs(out2 - ref2)))
    )

    print("KERNEL_OK")
</pallas_src>

<mosaic_0001>
module attributes {stable_mosaic.version = 11 : i64} {
  func.func @_layernorm_kernel(%arg0: i32, %arg1: memref<8x256xf32, #tpu.memory_space<vmem>>, %arg2: memref<2x256xf32, #tpu.memory_space<vmem>>, %arg3: memref<8x256xf32, #tpu.memory_space<vmem>>) attributes {dimension_semantics = [#tpu.dimension_semantics<parallel>], iteration_bounds = array<i64: 1>, scalar_prefetch = 0 : i64, scratch_operands = 0 : i64, tpu.core_type = #tpu.core_type<tc>, window_params = [{transform_indices = @transform_0, window_bounds = array<i64: 8, 256>}, {pipeline_mode = #tpu.pipeline_mode<synchronous>, transform_indices = @transform_1, window_bounds = array<i64: 2, 256>}, {transform_indices = @transform_2, window_bounds = array<i64: 8, 256>}]} {
    %c0 = arith.constant 0 : index
    %c0_0 = arith.constant 0 : index
    %0 = vector.load %arg1[%c0, %c0_0] : memref<8x256xf32, #tpu.memory_space<vmem>>, vector<8x256xf32>
    %cst = arith.constant dense<0.000000e+00> : vector<8xf32>
    %1 = vector.multi_reduction <add>, %0, %cst [1] : vector<8x256xf32> to vector<8xf32>
    %2 = vector.shape_cast %1 : vector<8xf32> to vector<8x1xf32>
    %cst_1 = arith.constant 3.906250e-03 : f32
    %3 = vector.broadcast %cst_1 : f32 to vector<8x1xf32>
    %4 = arith.mulf %2, %3 : vector<8x1xf32>
    %5 = vector.broadcast %4 : vector<8x1xf32> to vector<8x256xf32>
    %6 = arith.subf %0, %5 : vector<8x256xf32>
    %7 = arith.mulf %6, %6 : vector<8x256xf32>
    %cst_2 = arith.constant dense<0.000000e+00> : vector<8xf32>
    %8 = vector.multi_reduction <add>, %7, %cst_2 [1] : vector<8x256xf32> to vector<8xf32>
    %9 = vector.shape_cast %8 : vector<8xf32> to vector<8x1xf32>
    %cst_3 = arith.constant 3.906250e-03 : f32
    %10 = vector.broadcast %cst_3 : f32 to vector<8x1xf32>
    %11 = arith.mulf %9, %10 : vector<8x1xf32>
    %cst_4 = arith.constant 9.99999974E-6 : f32
    %12 = vector.broadcast %cst_4 : f32 to vector<8x1xf32>
    %13 = arith.addf %11, %12 : vector<8x1xf32>
    %14 = math.rsqrt %13 : vector<8x1xf32>
    %c0_5 = arith.constant 0 : index
    %c0_6 = arith.constant 0 : index
    %15 = vector.load %arg2[%c0_5, %c0_6] : memref<2x256xf32, #tpu.memory_space<vmem>>, vector<1x256xf32>
    %c1 = arith.constant 1 : index
    %c0_7 = arith.constant 0 : index
    %16 = vector.load %arg2[%c1, %c0_7] : memref<2x256xf32, #tpu.memory_space<vmem>>, vector<1x256xf32>
    %17 = vector.broadcast %14 : vector<8x1xf32> to vector<8x256xf32>
    %18 = arith.mulf %6, %17 : vector<8x256xf32>
    %19 = vector.broadcast %15 : vector<1x256xf32> to vector<8x256xf32>
    %20 = arith.mulf %18, %19 : vector<8x256xf32>
    %21 = vector.broadcast %16 : vector<1x256xf32> to vector<8x256xf32>
    %22 = arith.addf %20, %21 : vector<8x256xf32>
    %c0_8 = arith.constant 0 : index
    %c0_9 = arith.constant 0 : index
    %23 = vector.load %arg3[%c0_8, %c0_9] : memref<8x256xf32, #tpu.memory_space<vmem>>, vector<8x256xf32>
    tpu.vector_store %arg3[%c0_8, %c0_9], %22 {strides = array<i32>} : memref<8x256xf32, #tpu.memory_space<vmem>>, vector<8x256xf32>,
    return
  }
  func.func @transform_0(%arg0: i32) -> (i32, i32) {
    %c0_i32 = arith.constant 0 : i32
    %c0_i32_0 = arith.constant 0 : i32
    return %arg0, %c0_i32 : i32, i32
  }
  func.func @transform_1(%arg0: i32) -> (i32, i32) {
    %c0_i32 = arith.constant 0 : i32
    %c0_i32_0 = arith.constant 0 : i32
    %c0_i32_1 = arith.constant 0 : i32
    return %c0_i32, %c0_i32_0 : i32, i32
  }
  func.func @transform_2(%arg0: i32) -> (i32, i32) {
    %c0_i32 = arith.constant 0 : i32
    %c0_i32_0 = arith.constant 0 : i32
    return %arg0, %c0_i32 : i32, i32
  }
}

</mosaic_0001>

<bundles_post_ra>
// kernel: normalization_layer.1
= control target key start
LH: loop header
LB: loop body
LE: loop exit
PB: predicated region body
PF: predicated region fallthrough
CT: control target
= control target key end

     0   :  { %v33_v12 = vlaneseq  ;;  %s100_s0 = inlined_call_operand.vmem [shape: f32[8,256], index: 0, kind: input, shape index: {}]   ;;  %s101_s1 = inlined_call_operand.vmem [shape: f32[2,256], index: 1, kind: input, shape index: {}]   ;;  %s102_s2 = inlined_call_operand.vmem [shape: f32[8,256], index: 2, kind: output, shape index: {}]  }
   0x1   :  { %v11_v0 = vld [vmem:[%s100_s0] sm:$0xff]  ;;  %v12_v1 = vld [vmem:[%s100_s0 + $0x8] sm:$0xff] }
   0x2   :  { %v13_v2 = vadd.f32 %v12_v1, %v11_v0  ;;  %v34_v14 = vshrl.u32 %v33_v12, 7  ;;  %v27_v17 = vld [vmem:[%s101_s1] ss:$2 sm:$0x3] }
   0x3   :  { %v64_v18 = vld [vmem:[%s101_s1 + $0x1] ss:$2 sm:$0x3] }
   0x4   :  { %14 = vadd.xlane.f32.xlu0 %v13_v2  ;;  %v35_v15 = vsub.s32 0, %v34_v14  ;;  %v39_v16 = vsub.s32 1, %v34_v14 }
   0x6   :  { %v36_v19 = vrot.slane %v27_v17, %v35_v15  ;;  %v40_v20 = vrot.slane %v27_v17, %v39_v16  ;;  %v49_v22 = vrot.slane %v64_v18, %v35_v15  ;;  %v53_v23 = vrot.slane %v64_v18, %v39_v16 }
  0x91   :  { %v15_v3 = vpop.xlane.xlu0 %14 }
  0x92   :  { %v16_v4 = vmul.f32 0.00390625, %v15_v3 }
  0x94   :  { %v17_v5 = vsub.f32 %v11_v0, %v16_v4  ;;  %v18_v6 = vsub.f32 %v12_v1, %v16_v4 }
  0x96   :  { %v19_v7 = vmul.f32 %v17_v5, %v17_v5  ;;  %v20_v8 = vmul.f32 %v18_v6, %v18_v6 }
  0x98   :  { %v21_v9 = vadd.f32 %v20_v8, %v19_v7 }
  0x9a   :  { %22 = vadd.xlane.f32.xlu0 %v21_v9 }
 0x127   :  { %v23_v10 = vpop.xlane.xlu0 %22 }
 0x128   :  { %v24_v11 = vmul.f32 0.00390625, %v23_v10 }
 0x12a   :  { %v25_v13 = vadd.f32 1e-05, %v24_v11 }
 0x12c   :  { %65 = vrsqrt.f32 %v25_v13 }
 0x136   :  { %v66_v21 = vpop.eup %65 }
 0x137   :  { %v30_v24 = vmul.f32 %v66_v21, %v17_v5  ;;  %v31_v25 = vmul.f32 %v66_v21, %v18_v6 }
 0x139   :  { %v43_v26 = vmul.f32 %v36_v19, %v30_v24  ;;  %v44_v27 = vmul.f32 %v40_v20, %v31_v25 }
 0x13b   :  { %v56_v28 = vadd.f32 %v49_v22, %v43_v26  ;;  %v57_v29 = vadd.f32 %v53_v23, %v44_v27 }
 0x13d   :  { %58 = vst [vmem:[%s102_s2] sm:$0xff] %v56_v28  ;;  %59 = vst [vmem:[%s102_s2 + $0x8] sm:$0xff] %v57_v29 }

</bundles_post_ra>
